<compile_context>
chip_gen: v7x
topology: tpu7x:2x2x1
jax: 0.10.0
libtpu: 0.0.40
codegen_flags: <defaults>
</compile_context>

<pallas_src>
import numpy as np
import jax
import jax.numpy as jnp
from jax.experimental import pallas as pl
from jax.experimental.pallas import tpu as pltpu

HIDDEN = 64  # hidden width of the DQN MLP trunk (fixed by the module)


def _cdiv(a, b):
    return -(-a // b)


def _round_up(a, m):
    return _cdiv(a, m) * m


# ----------------------------------------------------------------------------
# Fused kernel factory (atom_num / dueling / qw are static Python values)
# ----------------------------------------------------------------------------
def _make_fused_kernel(atom_num, dueling, qw):
    A = atom_num

    def trunk(x_ref, w1_ref, b1_ref, w2_ref, b2_ref, wh_ref, bh_ref):
        # Cast inside the kernel so x streams in its native dtype.
        xf = x_ref[...].astype(jnp.float32)
        h1 = jnp.tanh(jnp.dot(xf, w1_ref[...],
                              preferred_element_type=jnp.float32) + b1_ref[...])
        h2 = jnp.tanh(jnp.dot(h1, w2_ref[...],
                              preferred_element_type=jnp.float32) + b2_ref[...])
        # Packed, lane-dense head matmul.  For dueling nets the combine
        # (q - mean_actions(q) + state) is already folded into wh/bh.
        return jnp.dot(h2, wh_ref[...],
                       preferred_element_type=jnp.float32) + bh_ref[...]

    if A == 1:
        def kernel(x_ref, w1_ref, b1_ref, w2_ref, b2_ref, wh_ref, bh_ref, o_ref):
            o_ref[...] = trunk(x_ref, w1_ref, b1_ref, w2_ref, b2_ref,
                               wh_ref, bh_ref)
        return kernel

    if not dueling:
        # NOTE: matches PyTorch exactly -- without dueling the tensor is NOT
        # reshaped, so log_softmax runs over the flat (out_dim*atom_num) axis.
        def kernel(x_ref, w1_ref, b1_ref, w2_ref, b2_ref, wh_ref, bh_ref, o_ref):
            heads = trunk(x_ref, w1_ref, b1_ref, w2_ref, b2_ref, wh_ref, bh_ref)
            lane = jax.lax.broadcasted_iota(jnp.int32, heads.shape, 1)
            valid = lane < qw                       # exclude zero-padded lanes
            m = jnp.max(jnp.where(valid, heads, -jnp.inf), axis=-1, keepdims=True)
            z = heads - m
            e = jnp.where(valid, jnp.exp(z), 0.0)
            lse = jnp.log(jnp.sum(e, axis=-1, keepdims=True))
            o_ref[...] = z - lse                    # lane-dense store; padding sliced off outside
        return kernel

    def kernel(x_ref, w1_ref, b1_ref, w2_ref, b2_ref, wh_ref, bh_ref,
               gmat_ref, o_ref):
        heads = trunk(x_ref, w1_ref, b1_ref, w2_ref, b2_ref, wh_ref, bh_ref)
        lane = jax.lax.broadcasted_iota(jnp.int32, heads.shape, 1)
        valid = lane < qw
        # Per-action-group log_softmax over atoms, entirely on the flat
        # lane-dense layout: a single row-max shift (exact for any common
        # shift), one full-width exp, and one tiny MXU matmul against the 0/1
        # group-indicator matrix that both sums exp per group and broadcasts
        # the group sum back to every lane of that group.
        m = jnp.max(jnp.where(valid, heads, -jnp.inf), axis=-1, keepdims=True)
        z = heads - m
        e = jnp.where(valid, jnp.exp(z), 0.0)
        s_grp = jnp.dot(e, gmat_ref[...], preferred_element_type=jnp.float32)
        o_ref[...] = z - jnp.log(jnp.where(valid, s_grp, 1.0))
    return kernel


# ----------------------------------------------------------------------------
# Head packing: fold dueling combine into the weights, pad to lane-dense width
# ----------------------------------------------------------------------------
def _fold_and_pad_heads(params, out_dim, atom_num, dueling, qw, qwp):
    wq, bq = params["wq"], params["bq"]
    if dueling:
        ws, bs = params["ws"], params["bs"]
        if atom_num == 1:
            wc = wq - jnp.mean(wq, axis=1, keepdims=True) + ws     # ws: (64,1) broadcast
            bc = bq - jnp.mean(bq, axis=1, keepdims=True) + bs
        else:
            w3 = wq.reshape(HIDDEN, out_dim, atom_num)
            b3 = bq.reshape(1, out_dim, atom_num)
            wc = (w3 - jnp.mean(w3, axis=1, keepdims=True)
                  + ws[:, None, :]).reshape(HIDDEN, qw)
            bc = (b3 - jnp.mean(b3, axis=1, keepdims=True)
                  + bs[:, None, :]).reshape(1, qw)
    else:
        wc, bc = wq, bq
    if qwp != qw:
        wc = jnp.pad(wc, ((0, 0), (0, qwp - qw)))
        bc = jnp.pad(bc, ((0, 0), (0, qwp - qw)))
    return wc, bc


# ----------------------------------------------------------------------------
# VMEM- and core-aware batch tile selection
# ----------------------------------------------------------------------------
def _pick_batch_tile(B, row_bytes, resident_bytes, vmem_budget):
    if B <= 256:
        return B                          # single full block
    avail = max(vmem_budget - 2 * resident_bytes, 1 << 20)
    tb_vmem = max(128, min(4096, (avail // row_bytes) // 8 * 8))
    # Keep an even number (>= 2) of grid steps: DMA/compute pipelining plus
    # both v7x TensorCores on the "parallel" batch axis (B=512 -> TB=256).
    n_tiles = 2 * _cdiv(B, 2 * tb_vmem)
    tb = _round_up(_cdiv(B, n_tiles), 8)  # sublane multiple
    return min(tb, tb_vmem)


# ----------------------------------------------------------------------------
# Wrapper
# ----------------------------------------------------------------------------
def mlp_forward(x, params, out_dim, atom_num, dueling):
    """Pallas implementation of MLP.forward (single fused pallas_call)."""
    B = x.shape[0]
    xf = x.reshape(B, -1)                 # Flatten(): free metadata reshape, no astype
    in_dim = xf.shape[1]
    A = atom_num
    QW = out_dim * A
    QWp = _round_up(QW, 128)              # lane-dense head / output width

    wc, bc = _fold_and_pad_heads(params, out_dim, A, dueling, QW, QWp)

    need_gmat = dueling and A > 1
    if need_gmat:
        idx = np.arange(QWp)
        gmat_np = (((idx[:, None] // A) == (idx[None, :] // A))
                   & (idx[:, None] < QW) & (idx[None, :] < QW))
        gmat = jnp.asarray(gmat_np, jnp.float32)

    # ---- VMEM budget / tiling ----------------------------------------------
    try:
        vmem_cap = int(pltpu.get_tpu_info().vmem_capacity_bytes)
    except Exception:
        vmem_cap = 64 * 1024 * 1024       # conservative (v7x per-core VMEM)
    vmem_budget = min(vmem_cap * 3 // 4, 100 * 1024 * 1024)

    x_isz = np.dtype(xf.dtype).itemsize
    resident_bytes = 4 * (in_dim * HIDDEN + HIDDEN + HIDDEN * HIDDEN + HIDDEN
                          + HIDDEN * QWp + QWp)
    if need_gmat:
        resident_bytes += 4 * QWp * QWp
    # Streamed bytes per batch row: double-buffered x + output tiles, plus an
    # allowance for in-kernel f32 temporaries (h1, h2, heads, exp, ...).
    row_bytes = 2 * in_dim * x_isz + 2 * QWp * 4 + 4 * (2 * HIDDEN + 4 * QWp)

    TB = _pick_batch_tile(B, row_bytes, resident_bytes, vmem_budget)
    grid_b = _cdiv(B, TB)                 # partial last block handled by Pallas (no jnp.pad)
    vmem_limit = int(min(vmem_budget,
                         max(2 * resident_bytes + TB * row_bytes + (8 << 20),
                             32 * 1024 * 1024)))

    kernel = _make_fused_kernel(A, dueling, QW)

    flops = 2 * B * (in_dim * HIDDEN + HIDDEN * HIDDEN + HIDDEN * QWp)
    if need_gmat:
        flops += 2 * B * QWp * QWp
    trans = B * (2 * HIDDEN + (QWp if A > 1 else 0))
    byts = int(B * in_dim * x_isz + resident_bytes + 4 * B * QWp)

    def build(use_buffered):
        def res(shape):
            # Resident weights/biases: same block every grid step -> stay in
            # VMEM; single-buffer them so the freed VMEM can go to bigger TB.
            if use_buffered:
                return pl.BlockSpec(shape, lambda i: (0, 0),
                                    pipeline_mode=pl.Buffered(1))
            return pl.BlockSpec(shape, lambda i: (0, 0))

        in_specs = [pl.BlockSpec((TB, in_dim), lambda i: (i, 0)),   # x streamed
                    res((in_dim, HIDDEN)), res((1, HIDDEN)),        # w1, b1
                    res((HIDDEN, HIDDEN)), res((1, HIDDEN)),        # w2, b2
                    res((HIDDEN, QWp)), res((1, QWp))]              # packed head
        if need_gmat:
            in_specs.append(res((QWp, QWp)))                        # group indicator

        return pl.pallas_call(
            kernel,
            out_shape=jax.ShapeDtypeStruct((B, QWp), jnp.float32),
            grid=(grid_b,),
            in_specs=in_specs,
            out_specs=pl.BlockSpec((TB, QWp), lambda i: (i, 0)),    # lane-dense stores
            compiler_params=pltpu.CompilerParams(
                dimension_semantics=("parallel",),
                vmem_limit_bytes=vmem_limit),
            cost_estimate=pl.CostEstimate(
                flops=flops, transcendentals=trans, bytes_accessed=byts),
        )

    args = (xf, params["w1"], params["b1"], params["w2"], params["b2"], wc, bc)
    if need_gmat:
        args = args + (gmat,)

    try:
        out = build(use_buffered=True)(*args)
    except Exception:
        # Fallback for jax versions that reject pl.Buffered(1) on resident
        # blocks: identical kernel with default double-buffered specs.
        out = build(use_buffered=False)(*args)

    out = out[:, :QW]                     # drop lane padding (plain JAX glue)
    if A > 1 and dueling:
        out = out.reshape(B, out_dim, A)  # view(), plain JAX glue
    return out


# ----------------------------------------------------------------------------
# Parameter init (matches nn.init.xavier_uniform_(gain=1), bias=0)
# ----------------------------------------------------------------------------
def init_params(key, in_dim, out_dim, atom_num, dueling):
    def xavier(k, fan_in, fan_out):
        limit = float(np.sqrt(6.0 / (fan_in + fan_out)))
        return jax.random.uniform(k, (fan_in, fan_out), jnp.float32, -limit, limit)

    ks = jax.random.split(key, 4)
    params = {
        "w1": xavier(ks[0], in_dim, HIDDEN), "b1": jnp.zeros((1, HIDDEN), jnp.float32),
        "w2": xavier(ks[1], HIDDEN, HIDDEN), "b2": jnp.zeros((1, HIDDEN), jnp.float32),
        "wq": xavier(ks[2], HIDDEN, out_dim * atom_num),
        "bq": jnp.zeros((1, out_dim * atom_num), jnp.float32),
    }
    if dueling:
        params["ws"] = xavier(ks[3], HIDDEN, atom_num)
        params["bs"] = jnp.zeros((1, atom_num), jnp.float32)
    return params


# ----------------------------------------------------------------------------
# Pure-JAX reference for correctness checking
# ----------------------------------------------------------------------------
def reference_forward(x, params, out_dim, atom_num, dueling):
    B = x.shape[0]
    xf = x.reshape(B, -1).astype(jnp.float32)
    h1 = jnp.tanh(xf @ params["w1"] + params["b1"])
    h2 = jnp.tanh(h1 @ params["w2"] + params["b2"])
    q = h2 @ params["wq"] + params["bq"]
    if atom_num == 1:
        if dueling:
            s = h2 @ params["ws"] + params["bs"]
            q = s + q - q.mean(1, keepdims=True)
        return q
    if dueling:
        q = q.reshape(B, -1, atom_num)
        s = (h2 @ params["ws"] + params["bs"])[:, None, :]
        q = s + q - q.mean(1, keepdims=True)
    return jax.nn.log_softmax(q, -1)


# ----------------------------------------------------------------------------
if __name__ == "__main__":
    key = jax.random.PRNGKey(0)
    configs = [
        # (B,   C, H, W, out_dim, atom_num, dueling)
        (2,   4, 4, 4, 4, 8, True),    # distributional + dueling (3-D output)
        (2,   4, 4, 4, 4, 1, True),    # plain dueling DQN
        (2,   4, 4, 4, 4, 8, False),   # distributional, no dueling (flat log_softmax)
        (2,   4, 4, 4, 4, 1, False),   # plain DQN
        (512, 4, 4, 4, 6, 8, True),    # TB=256, grid=2: pipelined + both v7x cores
        (300, 4, 4, 4, 4, 8, True),    # non-divisible batch: Pallas partial last block
    ]
    for (B, C, H, W, out_dim, atom_num, dueling) in configs:
        key, kx, kp = jax.random.split(key, 3)
        x = jax.random.normal(kx, (B, C, H, W), jnp.float32)
        params = init_params(kp, C * H * W, out_dim, atom_num, dueling)

        out = jax.block_until_ready(
            mlp_forward(x, params, out_dim, atom_num, dueling))
        ref = reference_forward(x, params, out_dim, atom_num, dueling)
        np.testing.assert_allclose(np.asarray(out), np.asarray(ref),
                                   rtol=1e-4, atol=2e-5)

        expected = ((B, out_dim, atom_num) if (dueling and atom_num > 1)
                    else (B, out_dim * atom_num))
        assert out.shape == expected, (out.shape, expected)

    print("KERNEL_OK")
</pallas_src>

<mosaic_0001>
module attributes {stable_mosaic.version = 11 : i64} {
  func.func @kernel(%arg0: i32, %arg1: memref<2x64xf32, #tpu.memory_space<vmem>>, %arg2: memref<64x64xf32, #tpu.memory_space<vmem>>, %arg3: memref<1x64xf32, #tpu.memory_space<vmem>>, %arg4: memref<64x64xf32, #tpu.memory_space<vmem>>, %arg5: memref<1x64xf32, #tpu.memory_space<vmem>>, %arg6: memref<64x128xf32, #tpu.memory_space<vmem>>, %arg7: memref<1x128xf32, #tpu.memory_space<vmem>>, %arg8: memref<128x128xf32, #tpu.memory_space<vmem>>, %arg9: memref<2x128xf32, #tpu.memory_space<vmem>>) attributes {dimension_semantics = [#tpu.dimension_semantics<parallel>], iteration_bounds = array<i64: 1>, scalar_prefetch = 0 : i64, scratch_operands = 0 : i64, tpu.core_type = #tpu.core_type<tc>, window_params = [{transform_indices = @transform_0, window_bounds = array<i64: 2, 64>}, {pipeline_mode = #tpu.pipeline_mode<synchronous>, transform_indices = @transform_1, window_bounds = array<i64: 64, 64>}, {pipeline_mode = #tpu.pipeline_mode<synchronous>, transform_indices = @transform_2, window_bounds = array<i64: 1, 64>}, {pipeline_mode = #tpu.pipeline_mode<synchronous>, transform_indices = @transform_3, window_bounds = array<i64: 64, 64>}, {pipeline_mode = #tpu.pipeline_mode<synchronous>, transform_indices = @transform_4, window_bounds = array<i64: 1, 64>}, {pipeline_mode = #tpu.pipeline_mode<synchronous>, transform_indices = @transform_5, window_bounds = array<i64: 64, 128>}, {pipeline_mode = #tpu.pipeline_mode<synchronous>, transform_indices = @transform_6, window_bounds = array<i64: 1, 128>}, {pipeline_mode = #tpu.pipeline_mode<synchronous>, transform_indices = @transform_7, window_bounds = array<i64: 128, 128>}, {transform_indices = @transform_8, window_bounds = array<i64: 2, 128>}]} {
    %c0 = arith.constant 0 : index
    %c0_0 = arith.constant 0 : index
    %0 = vector.load %arg1[%c0, %c0_0] : memref<2x64xf32, #tpu.memory_space<vmem>>, vector<2x64xf32>
    %c0_1 = arith.constant 0 : index
    %c0_2 = arith.constant 0 : index
    %1 = vector.load %arg2[%c0_1, %c0_2] : memref<64x64xf32, #tpu.memory_space<vmem>>, vector<64x64xf32>
    %cst = arith.constant dense<0.000000e+00> : vector<2x64xf32>
    %2 = tpu.matmul %0, %1, %cst {dimension_numbers = #tpu.dot_dimension_numbers<[1], [0], [0], [1], [0, 0, 1, 1], [], []>} : vector<2x64xf32>, vector<64x64xf32>, vector<2x64xf32> -> vector<2x64xf32>
    %c0_3 = arith.constant 0 : index
    %c0_4 = arith.constant 0 : index
    %3 = vector.load %arg3[%c0_3, %c0_4] : memref<1x64xf32, #tpu.memory_space<vmem>>, vector<1x64xf32>
    %4 = vector.broadcast %3 : vector<1x64xf32> to vector<2x64xf32>
    %5 = arith.addf %2, %4 : vector<2x64xf32>
    %6 = math.tanh %5 : vector<2x64xf32>
    %c0_5 = arith.constant 0 : index
    %c0_6 = arith.constant 0 : index
    %7 = vector.load %arg4[%c0_5, %c0_6] : memref<64x64xf32, #tpu.memory_space<vmem>>, vector<64x64xf32>
    %cst_7 = arith.constant dense<0.000000e+00> : vector<2x64xf32>
    %8 = tpu.matmul %6, %7, %cst_7 {dimension_numbers = #tpu.dot_dimension_numbers<[1], [0], [0], [1], [0, 0, 1, 1], [], []>} : vector<2x64xf32>, vector<64x64xf32>, vector<2x64xf32> -> vector<2x64xf32>
    %c0_8 = arith.constant 0 : index
    %c0_9 = arith.constant 0 : index
    %9 = vector.load %arg5[%c0_8, %c0_9] : memref<1x64xf32, #tpu.memory_space<vmem>>, vector<1x64xf32>
    %10 = vector.broadcast %9 : vector<1x64xf32> to vector<2x64xf32>
    %11 = arith.addf %8, %10 : vector<2x64xf32>
    %12 = math.tanh %11 : vector<2x64xf32>
    %c0_10 = arith.constant 0 : index
    %c0_11 = arith.constant 0 : index
    %13 = vector.load %arg6[%c0_10, %c0_11] : memref<64x128xf32, #tpu.memory_space<vmem>>, vector<64x128xf32>
    %cst_12 = arith.constant dense<0.000000e+00> : vector<2x128xf32>
    %14 = tpu.matmul %12, %13, %cst_12 {dimension_numbers = #tpu.dot_dimension_numbers<[1], [0], [0], [1], [0, 0, 1, 1], [], []>} : vector<2x64xf32>, vector<64x128xf32>, vector<2x128xf32> -> vector<2x128xf32>
    %c0_13 = arith.constant 0 : index
    %c0_14 = arith.constant 0 : index
    %15 = vector.load %arg7[%c0_13, %c0_14] : memref<1x128xf32, #tpu.memory_space<vmem>>, vector<1x128xf32>
    %16 = vector.broadcast %15 : vector<1x128xf32> to vector<2x128xf32>
    %17 = arith.addf %14, %16 : vector<2x128xf32>
    %18 = tpu.iota {dimensions = array<i32: 1>} : vector<2x128xi32>
    %c32_i32 = arith.constant 32 : i32
    %19 = vector.broadcast %c32_i32 : i32 to vector<2x128xi32>
    %20 = arith.cmpi slt, %18, %19 : vector<2x128xi32>
    %cst_15 = arith.constant 0xFF800000 : f32
    %21 = vector.broadcast %cst_15 : f32 to vector<2x128xf32>
    %22 = arith.select %20, %17, %21 : vector<2x128xi1>, vector<2x128xf32>
    %cst_16 = arith.constant dense<0xFF800000> : vector<2xf32>
    %23 = vector.multi_reduction <maximumf>, %22, %cst_16 [1] : vector<2x128xf32> to vector<2xf32>
    %24 = vector.shape_cast %23 : vector<2xf32> to vector<2x1xf32>
    %25 = vector.broadcast %24 : vector<2x1xf32> to vector<2x128xf32>
    %26 = arith.subf %17, %25 : vector<2x128xf32>
    %27 = math.exp %26 : vector<2x128xf32>
    %cst_17 = arith.constant 0.000000e+00 : f32
    %28 = vector.broadcast %cst_17 : f32 to vector<2x128xf32>
    %29 = arith.select %20, %27, %28 : vector<2x128xi1>, vector<2x128xf32>
    %c0_18 = arith.constant 0 : index
    %c0_19 = arith.constant 0 : index
    %30 = vector.load %arg8[%c0_18, %c0_19] : memref<128x128xf32, #tpu.memory_space<vmem>>, vector<128x128xf32>
    %cst_20 = arith.constant dense<0.000000e+00> : vector<2x128xf32>
    %31 = tpu.matmul %29, %30, %cst_20 {dimension_numbers = #tpu.dot_dimension_numbers<[1], [0], [0], [1], [0, 0, 1, 1], [], []>} : vector<2x128xf32>, vector<128x128xf32>, vector<2x128xf32> -> vector<2x128xf32>
    %cst_21 = arith.constant 1.000000e+00 : f32
    %32 = vector.broadcast %cst_21 : f32 to vector<2x128xf32>
    %33 = arith.select %20, %31, %32 : vector<2x128xi1>, vector<2x128xf32>
    %34 = math.log %33 : vector<2x128xf32>
    %35 = arith.subf %26, %34 : vector<2x128xf32>
    %c0_22 = arith.constant 0 : index
    %c0_23 = arith.constant 0 : index
    %36 = vector.load %arg9[%c0_22, %c0_23] : memref<2x128xf32, #tpu.memory_space<vmem>>, vector<2x128xf32>
    tpu.vector_store %arg9[%c0_22, %c0_23], %35 {strides = array<i32>} : memref<2x128xf32, #tpu.memory_space<vmem>>, vector<2x128xf32>,
    return
  }
  func.func @transform_0(%arg0: i32) -> (i32, i32) {
    %c0_i32 = arith.constant 0 : i32
    %c0_i32_0 = arith.constant 0 : i32
    return %arg0, %c0_i32 : i32, i32
  }
  func.func @transform_1(%arg0: i32) -> (i32, i32) {
    %c0_i32 = arith.constant 0 : i32
    %c0_i32_0 = arith.constant 0 : i32
    %c0_i32_1 = arith.constant 0 : i32
    return %c0_i32, %c0_i32_0 : i32, i32
  }
  func.func @transform_2(%arg0: i32) -> (i32, i32) {
    %c0_i32 = arith.constant 0 : i32
    %c0_i32_0 = arith.constant 0 : i32
    %c0_i32_1 = arith.constant 0 : i32
    return %c0_i32, %c0_i32_0 : i32, i32
  }
  func.func @transform_3(%arg0: i32) -> (i32, i32) {
    %c0_i32 = arith.constant 0 : i32
    %c0_i32_0 = arith.constant 0 : i32
    %c0_i32_1 = arith.constant 0 : i32
    return %c0_i32, %c0_i32_0 : i32, i32
  }
  func.func @transform_4(%arg0: i32) -> (i32, i32) {
    %c0_i32 = arith.constant 0 : i32
    %c0_i32_0 = arith.constant 0 : i32
    %c0_i32_1 = arith.constant 0 : i32
    return %c0_i32, %c0_i32_0 : i32, i32
  }
  func.func @transform_5(%arg0: i32) -> (i32, i32) {
    %c0_i32 = arith.constant 0 : i32
    %c0_i32_0 = arith.constant 0 : i32
    %c0_i32_1 = arith.constant 0 : i32
    return %c0_i32, %c0_i32_0 : i32, i32
  }
  func.func @transform_6(%arg0: i32) -> (i32, i32) {
    %c0_i32 = arith.constant 0 : i32
    %c0_i32_0 = arith.constant 0 : i32
    %c0_i32_1 = arith.constant 0 : i32
    return %c0_i32, %c0_i32_0 : i32, i32
  }
  func.func @transform_7(%arg0: i32) -> (i32, i32) {
    %c0_i32 = arith.constant 0 : i32
    %c0_i32_0 = arith.constant 0 : i32
    %c0_i32_1 = arith.constant 0 : i32
    return %c0_i32, %c0_i32_0 : i32, i32
  }
  func.func @transform_8(%arg0: i32) -> (i32, i32) {
    %c0_i32 = arith.constant 0 : i32
    %c0_i32_0 = arith.constant 0 : i32
    return %arg0, %c0_i32 : i32, i32
  }
}

module attributes {stable_mosaic.version = 11 : i64} {
  func.func @kernel(%arg0: i32, %arg1: memref<2x64xf32, #tpu.memory_space<vmem>>, %arg2: memref<64x64xf32, #tpu.memory_space<vmem>>, %arg3: memref<1x64xf32, #tpu.memory_space<vmem>>, %arg4: memref<64x64xf32, #tpu.memory_space<vmem>>, %arg5: memref<1x64xf32, #tpu.memory_space<vmem>>, %arg6: memref<64x128xf32, #tpu.memory_space<vmem>>, %arg7: memref<1x128xf32, #tpu.memory_space<vmem>>, %arg8: memref<128x128xf32, #tpu.memory_space<vmem>>, %arg9: memref<2x128xf32, #tpu.memory_space<vmem>>) attributes {dimension_semantics = [#tpu.dimension_semantics<parallel>], iteration_bounds = array<i64: 1>, scalar_prefetch = 0 : i64, scratch_operands = 0 : i64, tpu.core_type = #tpu.core_type<tc>, window_params = [{transform_indices = @transform_0, window_bounds = array<i64: 2, 64>}, {pipeline_mode = #tpu.pipeline_mode<synchronous>, transform_indices = @transform_1, window_bounds = array<i64: 64, 64>}, {pipeline_mode = #tpu.pipeline_mode<synchronous>, transform_indices = @transform_2, window_bounds = array<i64: 1, 64>}, {pipeline_mode = #tpu.pipeline_mode<synchronous>, transform_indices = @transform_3, window_bounds = array<i64: 64, 64>}, {pipeline_mode = #tpu.pipeline_mode<synchronous>, transform_indices = @transform_4, window_bounds = array<i64: 1, 64>}, {pipeline_mode = #tpu.pipeline_mode<synchronous>, transform_indices = @transform_5, window_bounds = array<i64: 64, 128>}, {pipeline_mode = #tpu.pipeline_mode<synchronous>, transform_indices = @transform_6, window_bounds = array<i64: 1, 128>}, {pipeline_mode = #tpu.pipeline_mode<synchronous>, transform_indices = @transform_7, window_bounds = array<i64: 128, 128>}, {transform_indices = @transform_8, window_bounds = array<i64: 2, 128>}]} {
    %c0 = arith.constant 0 : index
    %c0_0 = arith.constant 0 : index
    %0 = vector.load %arg1[%c0, %c0_0] : memref<2x64xf32, #tpu.memory_space<vmem>>, vector<2x64xf32>
    %c0_1 = arith.constant 0 : index
    %c0_2 = arith.constant 0 : index
    %1 = vector.load %arg2[%c0_1, %c0_2] : memref<64x64xf32, #tpu.memory_space<vmem>>, vector<64x64xf32>
    %cst = arith.constant dense<0.000000e+00> : vector<2x64xf32>
    %2 = tpu.matmul %0, %1, %cst {dimension_numbers = #tpu.dot_dimension_numbers<[1], [0], [0], [1], [0, 0, 1, 1], [], []>} : vector<2x64xf32>, vector<64x64xf32>, vector<2x64xf32> -> vector<2x64xf32>
    %c0_3 = arith.constant 0 : index
    %c0_4 = arith.constant 0 : index
    %3 = vector.load %arg3[%c0_3, %c0_4] : memref<1x64xf32, #tpu.memory_space<vmem>>, vector<1x64xf32>
    %4 = vector.broadcast %3 : vector<1x64xf32> to vector<2x64xf32>
    %5 = arith.addf %2, %4 : vector<2x64xf32>
    %6 = math.tanh %5 : vector<2x64xf32>
    %c0_5 = arith.constant 0 : index
    %c0_6 = arith.constant 0 : index
    %7 = vector.load %arg4[%c0_5, %c0_6] : memref<64x64xf32, #tpu.memory_space<vmem>>, vector<64x64xf32>
    %cst_7 = arith.constant dense<0.000000e+00> : vector<2x64xf32>
    %8 = tpu.matmul %6, %7, %cst_7 {dimension_numbers = #tpu.dot_dimension_numbers<[1], [0], [0], [1], [0, 0, 1, 1], [], []>} : vector<2x64xf32>, vector<64x64xf32>, vector<2x64xf32> -> vector<2x64xf32>
    %c0_8 = arith.constant 0 : index
    %c0_9 = arith.constant 0 : index
    %9 = vector.load %arg5[%c0_8, %c0_9] : memref<1x64xf32, #tpu.memory_space<vmem>>, vector<1x64xf32>
    %10 = vector.broadcast %9 : vector<1x64xf32> to vector<2x64xf32>
    %11 = arith.addf %8, %10 : vector<2x64xf32>
    %12 = math.tanh %11 : vector<2x64xf32>
    %c0_10 = arith.constant 0 : index
    %c0_11 = arith.constant 0 : index
    %13 = vector.load %arg6[%c0_10, %c0_11] : memref<64x128xf32, #tpu.memory_space<vmem>>, vector<64x128xf32>
    %cst_12 = arith.constant dense<0.000000e+00> : vector<2x128xf32>
    %14 = tpu.matmul %12, %13, %cst_12 {dimension_numbers = #tpu.dot_dimension_numbers<[1], [0], [0], [1], [0, 0, 1, 1], [], []>} : vector<2x64xf32>, vector<64x128xf32>, vector<2x128xf32> -> vector<2x128xf32>
    %c0_13 = arith.constant 0 : index
    %c0_14 = arith.constant 0 : index
    %15 = vector.load %arg7[%c0_13, %c0_14] : memref<1x128xf32, #tpu.memory_space<vmem>>, vector<1x128xf32>
    %16 = vector.broadcast %15 : vector<1x128xf32> to vector<2x128xf32>
    %17 = arith.addf %14, %16 : vector<2x128xf32>
    %18 = tpu.iota {dimensions = array<i32: 1>} : vector<2x128xi32>
    %c32_i32 = arith.constant 32 : i32
    %19 = vector.broadcast %c32_i32 : i32 to vector<2x128xi32>
    %20 = arith.cmpi slt, %18, %19 : vector<2x128xi32>
    %cst_15 = arith.constant 0xFF800000 : f32
    %21 = vector.broadcast %cst_15 : f32 to vector<2x128xf32>
    %22 = arith.select %20, %17, %21 : vector<2x128xi1>, vector<2x128xf32>
    %cst_16 = arith.constant dense<0xFF800000> : vector<2xf32>
    %23 = vector.multi_reduction <maximumf>, %22, %cst_16 [1] : vector<2x128xf32> to vector<2xf32>
    %24 = vector.shape_cast %23 : vector<2xf32> to vector<2x1xf32>
    %25 = vector.broadcast %24 : vector<2x1xf32> to vector<2x128xf32>
    %26 = arith.subf %17, %25 : vector<2x128xf32>
    %27 = math.exp %26 : vector<2x128xf32>
    %cst_17 = arith.constant 0.000000e+00 : f32
    %28 = vector.broadcast %cst_17 : f32 to vector<2x128xf32>
    %29 = arith.select %20, %27, %28 : vector<2x128xi1>, vector<2x128xf32>
    %c0_18 = arith.constant 0 : index
    %c0_19 = arith.constant 0 : index
    %30 = vector.load %arg8[%c0_18, %c0_19] : memref<128x128xf32, #tpu.memory_space<vmem>>, vector<128x128xf32>
    %cst_20 = arith.constant dense<0.000000e+00> : vector<2x128xf32>
    %31 = tpu.matmul %29, %30, %cst_20 {dimension_numbers = #tpu.dot_dimension_numbers<[1], [0], [0], [1], [0, 0, 1, 1], [], []>} : vector<2x128xf32>, vector<128x128xf32>, vector<2x128xf32> -> vector<2x128xf32>
    %cst_21 = arith.constant 1.000000e+00 : f32
    %32 = vector.broadcast %cst_21 : f32 to vector<2x128xf32>
    %33 = arith.select %20, %31, %32 : vector<2x128xi1>, vector<2x128xf32>
    %34 = math.log %33 : vector<2x128xf32>
    %35 = arith.subf %26, %34 : vector<2x128xf32>
    %c0_22 = arith.constant 0 : index
    %c0_23 = arith.constant 0 : index
    %36 = vector.load %arg9[%c0_22, %c0_23] : memref<2x128xf32, #tpu.memory_space<vmem>>, vector<2x128xf32>
    tpu.vector_store %arg9[%c0_22, %c0_23], %35 {strides = array<i32>} : memref<2x128xf32, #tpu.memory_space<vmem>>, vector<2x128xf32>,
    return
  }
  func.func @transform_0(%arg0: i32) -> (i32, i32) {
    %c0_i32 = arith.constant 0 : i32
    %c0_i32_0 = arith.constant 0 : i32
    return %arg0, %c0_i32 : i32, i32
  }
  func.func @transform_1(%arg0: i32) -> (i32, i32) {
    %c0_i32 = arith.constant 0 : i32
    %c0_i32_0 = arith.constant 0 : i32
    %c0_i32_1 = arith.constant 0 : i32
    return %c0_i32, %c0_i32_0 : i32, i32
  }
  func.func @transform_2(%arg0: i32) -> (i32, i32) {
    %c0_i32 = arith.constant 0 : i32
    %c0_i32_0 = arith.constant 0 : i32
    %c0_i32_1 = arith.constant 0 : i32
    return %c0_i32, %c0_i32_0 : i32, i32
  }
  func.func @transform_3(%arg0: i32) -> (i32, i32) {
    %c0_i32 = arith.constant 0 : i32
    %c0_i32_0 = arith.constant 0 : i32
    %c0_i32_1 = arith.constant 0 : i32
    return %c0_i32, %c0_i32_0 : i32, i32
  }
  func.func @transform_4(%arg0: i32) -> (i32, i32) {
    %c0_i32 = arith.constant 0 : i32
    %c0_i32_0 = arith.constant 0 : i32
    %c0_i32_1 = arith.constant 0 : i32
    return %c0_i32, %c0_i32_0 : i32, i32
  }
  func.func @transform_5(%arg0: i32) -> (i32, i32) {
    %c0_i32 = arith.constant 0 : i32
    %c0_i32_0 = arith.constant 0 : i32
    %c0_i32_1 = arith.constant 0 : i32
    return %c0_i32, %c0_i32_0 : i32, i32
  }
  func.func @transform_6(%arg0: i32) -> (i32, i32) {
    %c0_i32 = arith.constant 0 : i32
    %c0_i32_0 = arith.constant 0 : i32
    %c0_i32_1 = arith.constant 0 : i32
    return %c0_i32, %c0_i32_0 : i32, i32
  }
  func.func @transform_7(%arg0: i32) -> (i32, i32) {
    %c0_i32 = arith.constant 0 : i32
    %c0_i32_0 = arith.constant 0 : i32
    %c0_i32_1 = arith.constant 0 : i32
    return %c0_i32, %c0_i32_0 : i32, i32
  }
  func.func @transform_8(%arg0: i32) -> (i32, i32) {
    %c0_i32 = arith.constant 0 : i32
    %c0_i32_0 = arith.constant 0 : i32
    return %arg0, %c0_i32 : i32, i32
  }
}

</mosaic_0001>

<bundles_post_ra>
// kernel: tpu_custom_call.1
= control target key start
LH: loop header
LB: loop body
LE: loop exit
PB: predicated region body
PF: predicated region fallthrough
CT: control target
= control target key end

     0   :  { %13 = vsyncpa [#allocation3], 0  ;;  %s1025_s0 = inlined_call_operand.hbm [shape: f32[2,64], index: 0, kind: input, shape index: {}]   ;;  %s1026_s1 = inlined_call_operand.hbm [shape: f32[64,64], index: 1, kind: input, shape index: {}]   ;;  %s1027_s2 = inlined_call_operand.vmem [shape: f32[1,64], index: 2, kind: input, shape index: {}]   ;;  %s1028_s3 = inlined_call_operand.hbm [shape: f32[64,64], index: 3, kind: input, shape index: {}]   ;;  %s1029_s4 = inlined_call_operand.vmem [shape: f32[1,64], index: 4, kind: input, shape index: {}]   ;;  %s1030_s5 = inlined_call_operand.hbm [shape: f32[64,128], index: 5, kind: input, shape index: {}]   ;;  %s1031_s6 = inlined_call_operand.vmem [shape: f32[1,128], index: 6, kind: input, shape index: {}]   ;;  %s1032_s7 = inlined_call_operand.hbm [shape: f32[128,128], index: 7, kind: input, shape index: {}]   ;;  %s1033_s8 = inlined_call_operand.hbm [shape: f32[2,128], index: 8, kind: output, shape index: {}]  }
   0x1   :  { %14 = vsyncpa [#allocation6], 0 }
   0x2   :  { %15 = vsyncpa [#allocation9], 0 }
   0x3   :  { %16 = vsyncpa [#allocation4], 0  ;;  %s846_s27 = smov [#allocation5]   ;;  %s706_s9 = scalar_lea.hbm %s1026_s1, 1024 }
   0x4   :  { %s32_s28 = sshll.u32 %s846_s27, 4  ;;  %p707_p0 = scmp.ne.s32.totalorder %s1026_s1, %s706_s9  ;;  %s33_s28 = int_to_ptr.vmem [resolvable:$true] %s32_s28 }
   0x5   :  { %p710_p1 = scmp.lt.u32.totalorder %s706_s9, %s1026_s1 }
   0x7   :  { %p712_p2 = pnand %p710_p1, %p707_p0 }
   0x9   :  { %715 = shalt.err (!%p712_p2)
}
   0xa   :  { %s716_s14 = scalar_lea.vmem %s33_s28, 1024  ;;  %p721_p4 = scmp.lt.s32.totalorder %s33_s28, %s33_s28 }
   0xb   :  { %p717_p3 = scmp.ne.s32.totalorder %s33_s28, %s716_s14  ;;  %p722_p5 = scmp.lt.s32.totalorder %s716_s14, %s716_s14 }
   0xd   :  { %p723_p6 = por %p722_p5, %p721_p4 }
   0xf   :  { %p724_p7 = pnand %p723_p6, %p717_p3 }
  0x11   :  { %727 = shalt.err (!%p724_p7)
}
  0x12   :  { %s847_s15 = smov 128   ;;  %s848_s16 = smov 8  }
  0x13   :  { %38 = dma.hbm_to_vmem [thread:$0]  %s1026_s1, 1024, %s33_s28, [#allocation6], %s847_s15, %s847_s15, %s848_s16  }
  0x14   :  { %s849_s19 = smov [#allocation8]   ;;  %s850_s21 = smov [#allocation2]  }
  0x15   :  { %s60_s20 = sshll.u32 %s849_s19, 4  ;;  %s23_s22 = sshll.u32 %s850_s21, 4  ;;  %s61_s20 = int_to_ptr.vmem [resolvable:$true] %s60_s20  ;;  %s24_s22 = int_to_ptr.vmem [resolvable:$true] %s23_s22 }
  0x16   :  { %s728_s25 = scalar_lea.hbm %s1030_s5, 1024 }
  0x17   :  { %p729_p8 = scmp.ne.s32.totalorder %s1030_s5, %s728_s25  ;;  %p732_p9 = scmp.lt.u32.totalorder %s728_s25, %s1030_s5 }
  0x19   :  { %p734_p10 = pnand %p732_p9, %p729_p8 }
  0x1b   :  { %737 = shalt.err (!%p734_p10)
}
  0x1c   :  { %s738_s1 = scalar_lea.vmem %s61_s20, 1024  ;;  %p743_p12 = scmp.lt.s32.totalorder %s61_s20, %s61_s20 }
  0x1d   :  { %p739_p11 = scmp.ne.s32.totalorder %s61_s20, %s738_s1  ;;  %p744_p13 = scmp.lt.s32.totalorder %s738_s1, %s738_s1 }
  0x1f   :  { %p745_p0 = por %p744_p13, %p743_p12 }
  0x21   :  { %p746_p1 = pnand %p745_p0, %p739_p11 }
  0x23   :  { %749 = shalt.err (!%p746_p1)
}
  0x24   :  { %66 = dma.hbm_to_vmem [thread:$0]  %s1030_s5, 1024, %s61_s20, [#allocation9], %s847_s15, %s847_s15, %s848_s16  }
  0x25   :  { %s750_s12 = scalar_lea.hbm %s1025_s0, 32 }
  0x26   :  { %p751_p2 = scmp.ne.s32.totalorder %s1025_s0, %s750_s12  ;;  %p754_p3 = scmp.lt.u32.totalorder %s750_s12, %s1025_s0 }
  0x28   :  { %p756_p4 = pnand %p754_p3, %p751_p2 }
  0x2a   :  { %759 = shalt.err (!%p756_p4)
}
  0x2b   :  { %s760_s19 = scalar_lea.vmem %s24_s22, 32  ;;  %p765_p6 = scmp.lt.s32.totalorder %s24_s22, %s24_s22 }
  0x2c   :  { %p761_p5 = scmp.ne.s32.totalorder %s24_s22, %s760_s19  ;;  %p766_p7 = scmp.lt.s32.totalorder %s760_s19, %s760_s19 }
  0x2e   :  { %p767_p8 = por %p766_p7, %p765_p6 }
  0x30   :  { %p768_p9 = pnand %p767_p8, %p761_p5 }
  0x32   :  { %771 = shalt.err (!%p768_p9)
}
  0x33   :  { %26 = dma.hbm_to_vmem [thread:$0]  %s1025_s0, 32, %s24_s22, [#allocation3]  }
  0x34   :  { %s851_s21 = smov [#allocation7]   ;;  %s852_s24 = smov [#allocation10]  }
  0x35   :  { %s46_s23 = sshll.u32 %s851_s21, 4  ;;  %s74_s25 = sshll.u32 %s852_s24, 4  ;;  %s47_s23 = int_to_ptr.vmem [resolvable:$true] %s46_s23  ;;  %s75_s25 = int_to_ptr.vmem [resolvable:$true] %s74_s25 }
  0x36   :  { %s772_s29 = scalar_lea.hbm %s1028_s3, 1024 }
  0x37   :  { %p773_p10 = scmp.ne.s32.totalorder %s1028_s3, %s772_s29  ;;  %p776_p11 = scmp.lt.u32.totalorder %s772_s29, %s1028_s3 }
  0x39   :  { %p778_p12 = pnand %p776_p11, %p773_p10 }
  0x3b   :  { %781 = shalt.err (!%p778_p12)
}
  0x3c   :  { %s782_s0 = scalar_lea.vmem %s47_s23, 1024  ;;  %p787_p0 = scmp.lt.s32.totalorder %s47_s23, %s47_s23 }
  0x3d   :  { %p783_p13 = scmp.ne.s32.totalorder %s47_s23, %s782_s0  ;;  %p788_p1 = scmp.lt.s32.totalorder %s782_s0, %s782_s0 }
  0x3f   :  { %p789_p2 = por %p788_p1, %p787_p0 }
  0x41   :  { %p790_p3 = pnand %p789_p2, %p783_p13 }
  0x43   :  { %793 = shalt.err (!%p790_p3)
}
  0x44   :  { %52 = dma.hbm_to_vmem [thread:$0]  %s1028_s3, 1024, %s47_s23, [#allocation6], %s847_s15, %s847_s15, %s848_s16  }
  0x45   :  { %s794_s13 = scalar_lea.hbm %s1032_s7, 2048 }
  0x46   :  { %p795_p4 = scmp.ne.s32.totalorder %s1032_s7, %s794_s13  ;;  %p798_p5 = scmp.lt.u32.totalorder %s794_s13, %s1032_s7 }
  0x48   :  { %p800_p6 = pnand %p798_p5, %p795_p4 }
  0x4a   :  { %803 = shalt.err (!%p800_p6)
}
  0x4b   :  { %s804_s5 = scalar_lea.vmem %s75_s25, 2048  ;;  %p809_p8 = scmp.lt.s32.totalorder %s75_s25, %s75_s25 }
  0x4c   :  { %p805_p7 = scmp.ne.s32.totalorder %s75_s25, %s804_s5  ;;  %p810_p9 = scmp.lt.s32.totalorder %s804_s5, %s804_s5 }
  0x4e   :  { %p811_p10 = por %p810_p9, %p809_p8 }
  0x50   :  { %p812_p11 = pnand %p811_p10, %p805_p7 }
  0x52   :  { %815 = shalt.err (!%p812_p11)
}
  0x53   :  { %80 = dma.hbm_to_vmem [thread:$0]  %s1032_s7, 2048, %s75_s25, [#allocation9], %s847_s15, %s847_s15, %s848_s16  }
  0x54   :  { %838 = dma.done.wait [#allocation3], 32  }
  0x55   :  { %839 = vsyncadd [#allocation3], 4294967264 }
  0x56   :  { %840 = dma.done.wait [#allocation6], 2048  }
  0x57   :  { %841 = vsyncadd [#allocation6], 4294965248 }
  0x58   :  { %842 = dma.done.wait [#allocation9], 3072  }
  0x59   :  { %843 = vsyncadd [#allocation9], 4294964224  ;;  %v853_v0 = vmov 0.0|0.0   ;;  %vm854_vm0 = vmmov 0   ;;  %v855_v1 = vmov 0.0   ;;  %v97_v2 = vld [vmem:[#allocation5] sm:$0xff]  ;;  %v364_v61 = vlaneseq }
  0x5a   :  { %627 = vmatprep.subr.bf16.mxu0 %v853_v0  ;;  %551 = vmatprep.mubr.msk.f32.mxu0 %vm854_vm0, %v855_v1  ;;  %v98_v3 = vld [vmem:[#allocation5 + $0x8] sm:$0xff]  ;;  %v99_v4 = vld [vmem:[#allocation5 + $0x10] sm:$0xff]  ;;  %v100_v6 = vld [vmem:[#allocation5 + $0x18] sm:$0xff]  ;;  %vm112_vm1 = vcmask 523264   ;;  %vm368_vm3 = vcmask 1041408  }
  0x5b   :  { %639 = vmatprep.subr.bf16.mxu1 %v853_v0  ;;  %570 = vmatprep.mubr.msk.f32.mxu1 %vm854_vm0, %v855_v1  ;;  %v628_v5 = vpack.c.bf16 %v98_v3, %v97_v2  ;;  %v631_v7 = vpack.c.bf16 %v100_v6, %v99_v4  ;;  %v187_v8 = vld [vmem:[#allocation7] sm:$0xff]  ;;  %v188_v9 = vld [vmem:[#allocation7 + $0x8] sm:$0xff]  ;;  %v103_v14 = vld [vmem:[#allocation5 + $0x30] sm:$0xff]  ;;  %v365_v62 = vand.u32 127, %v364_v61 }
  0x5c   :  { %v101_v10 = vld [vmem:[#allocation5 + $0x20] sm:$0xff]  ;;  %v102_v11 = vld [vmem:[#allocation5 + $0x28] sm:$0xff]  ;;  %v640_v12 = vpack.c.bf16 %v188_v9, %v187_v8  ;;  %v104_v15 = vld [vmem:[#allocation5 + $0x38] sm:$0xff] }
  0x5d   :  { %629 = vmatpush3.bf16.msra.mxu0 %v628_v5  ;;  %v634_v13 = vpack.c.bf16 %v102_v11, %v101_v10  ;;  %v637_v16 = vpack.c.bf16 %v104_v15, %v103_v14  ;;  %v96_v17 = vld [vmem:[#allocation2] sm:$0x3]  ;;  %v189_v18 = vld [vmem:[#allocation7 + $0x10] sm:$0xff]  ;;  %v191_v21 = vld [vmem:[#allocation7 + $0x20] sm:$0xff]  ;;  %vm366_vm2 = vcmp.lt.s32.totalorder %v365_v62, 32 }
  0x5e   :  { %630 = vmatprep.subr.bf16.mxu0 %v853_v0  ;;  %641 = vmatpush3.bf16.msra.mxu1 %v640_v12  ;;  %v190_v19 = vld [vmem:[#allocation7 + $0x18] sm:$0xff]  ;;  %v192_v22 = vld [vmem:[#allocation7 + $0x28] sm:$0xff]  ;;  %v193_v24 = vld [vmem:[#allocation7 + $0x30] sm:$0xff] }
  0x5f   :  { %642 = vmatprep.subr.bf16.mxu1 %v853_v0  ;;  %v643_v20 = vpack.c.bf16 %v190_v19, %v189_v18  ;;  %v646_v23 = vpack.c.bf16 %v192_v22, %v191_v21  ;;  %v194_v25 = vld [vmem:[#allocation7 + $0x38] sm:$0xff]  ;;  %v276_v27 = vld [vmem:[#allocation8] sm:$0xff]  ;;  %v277_v28 = vld [vmem:[#allocation8 + $0x8] sm:$0xff] }
  0x60   :  { %v649_v26 = vpack.c.bf16 %v194_v25, %v193_v24  ;;  %v652_v29 = vpack.c.bf16 %v277_v28, %v276_v27  ;;  %v484_v30 = vld [vmem:[%s1027_s2] ss:$0 sm:$0xff]  ;;  %v278_v35 = vld [vmem:[#allocation8 + $0x10] sm:$0xff]  ;;  %v280_v38 = vld [vmem:[#allocation8 + $0x20] sm:$0xff] }
  0x61   :  { %632 = vmatpush3.bf16.msra.mxu0 %v631_v7  ;;  %v279_v36 = vld [vmem:[#allocation8 + $0x18] sm:$0xff]  ;;  %v281_v39 = vld [vmem:[#allocation8 + $0x28] sm:$0xff]  ;;  %v282_v41 = vld [vmem:[#allocation8 + $0x30] sm:$0xff] }
  0x62   :  { %633 = vmatprep.subr.bf16.mxu0 %v853_v0  ;;  %644 = vmatpush3.bf16.msra.mxu1 %v643_v20  ;;  %v655_v37 = vpack.c.bf16 %v279_v36, %v278_v35  ;;  %v658_v40 = vpack.c.bf16 %v281_v39, %v280_v38  ;;  %v283_v42 = vld [vmem:[#allocation8 + $0x38] sm:$0xff]  ;;  %v376_v49 = vld [vmem:[#allocation10] sm:$0xff]  ;;  %v377_v50 = vld [vmem:[#allocation10 + $0x8] sm:$0xff] }
  0x63   :  { %645 = vmatprep.subr.bf16.mxu1 %v853_v0  ;;  %v661_v43 = vpack.c.bf16 %v283_v42, %v282_v41  ;;  %v486_v44 = vld [vmem:[%s1029_s4] ss:$0 sm:$0xff]  ;;  %v378_v51 = vld [vmem:[#allocation10 + $0x10] sm:$0xff]  ;;  %v664_v52 = vpack.c.bf16 %v377_v50, %v376_v49  ;;  %v380_v55 = vld [vmem:[#allocation10 + $0x20] sm:$0xff] }
  0x64   :  { %v379_v53 = vld [vmem:[#allocation10 + $0x18] sm:$0xff]  ;;  %v381_v56 = vld [vmem:[#allocation10 + $0x28] sm:$0xff]  ;;  %v382_v58 = vld [vmem:[#allocation10 + $0x30] sm:$0xff] }
  0x65   :  { %635 = vmatpush3.bf16.msra.mxu0 %v634_v13  ;;  %v667_v54 = vpack.c.bf16 %v379_v53, %v378_v51  ;;  %v670_v57 = vpack.c.bf16 %v381_v56, %v380_v55  ;;  %v383_v59 = vld [vmem:[#allocation10 + $0x38] sm:$0xff]  ;;  %v384_v6 = vld [vmem:[#allocation10 + $0x40] sm:$0xff]  ;;  %v385_v7 = vld [vmem:[#allocation10 + $0x48] sm:$0xff] }
  0x66   :  { %636 = vmatprep.subr.bf16.mxu0 %v853_v0  ;;  %647 = vmatpush3.bf16.msra.mxu1 %v646_v23  ;;  %v673_v60 = vpack.c.bf16 %v383_v59, %v382_v58  ;;  %v488_v63 = vld [vmem:[%s1031_s6] ss:$0 sm:$0xff]  ;;  %v676_v8 = vpack.c.bf16 %v385_v7, %v384_v6  ;;  %v386_v9 = vld [vmem:[#allocation10 + $0x50] sm:$0xff]  ;;  %v388_v12 = vld [vmem:[#allocation10 + $0x60] sm:$0xff]  ;;  %s856_s6 = smov [#allocation11]  }
  0x67   :  { %648 = vmatprep.subr.bf16.mxu1 %v853_v0  ;;  %v387_v10 = vld [vmem:[#allocation10 + $0x58] sm:$0xff]  ;;  %v389_v13 = vld [vmem:[#allocation10 + $0x68] sm:$0xff]  ;;  %v390_v15 = vld [vmem:[#allocation10 + $0x70] sm:$0xff]  ;;  %s473_s23 = sshll.u32 %s856_s6, 4  ;;  %s474_s23 = int_to_ptr.vmem [resolvable:$true] %s473_s23 }
  0x68   :  { %v679_v11 = vpack.c.bf16 %v387_v10, %v386_v9  ;;  %v682_v14 = vpack.c.bf16 %v389_v13, %v388_v12  ;;  %s816_s24 = scalar_lea.vmem %s474_s23, 32  ;;  %p821_p13 = scmp.lt.s32.totalorder %s474_s23, %s474_s23 }
  0x69   :  { %638 = vmatpush3.bf16.msra.mxu0 %v637_v16  ;;  %v391_v16 = vld [vmem:[#allocation10 + $0x78] sm:$0xff]  ;;  %p817_p12 = scmp.ne.s32.totalorder %s474_s23, %s816_s24  ;;  %p822_p0 = scmp.lt.s32.totalorder %s816_s24, %s816_s24 }
  0x6a   :  { %651 = vmatprep.subr.bf16.mxu0 %v853_v0  ;;  %650 = vmatpush3.bf16.msra.mxu1 %v649_v26 }
  0x6b   :  { %663 = vmatprep.subr.bf16.mxu1 %v853_v0  ;;  %p823_p1 = por %p822_p0, %p821_p13 }
  0x6c   :  { %552 = vmatmul.mubr.msk.f32.vlgmr.msra.gmra.mrb[0].mxu0 %vm112_vm1, %v96_v17  ;;  %v685_v17 = vpack.c.bf16 %v391_v16, %v390_v15 }
  0x6d   :  { %589 = vmatprep.mubr.msk.f32.mxu0 %vm854_vm0, %v855_v1  ;;  %653 = vmatpush3.bf16.msra.mxu0 %v652_v29  ;;  %p824_p2 = pnand %p823_p1, %p817_p12 }
  0x6e   :  { %654 = vmatprep.subr.bf16.mxu0 %v853_v0 }
  0x71   :  { %656 = vmatpush3.bf16.msra.mxu0 %v655_v37 }
  0x72   :  { %657 = vmatprep.subr.bf16.mxu0 %v853_v0 }
  0x75   :  { %659 = vmatpush3.bf16.msra.mxu0 %v658_v40 }
  0x76   :  { %660 = vmatprep.subr.bf16.mxu0 %v853_v0 }
  0x79   :  { %662 = vmatpush3.bf16.msra.mxu0 %v661_v43 }
 0x13f   :  { %v182_v31 = vpop.f32.mrb[0].mxu0 }
 0x140   :  { %v183_v32 = vadd.f32 %v484_v30, %v182_v31  ;;  %v553_v33 = vpop.f32.mrb[1].mxu0 }
 0x142   :  { %698 = vtanh.f32 %v183_v32 }
 0x14c   :  { %v699_v34 = vpop.eup %698 }
 0x14d   :  { %571 = vmatmul.mubr.msk.f32.vlgmr.msra.gmra.mrb[0].mxu1 %vm112_vm1, %v699_v34 }
 0x14e   :  { %624 = vmatprep.mubr.msk.f32.mxu1 %vm854_vm0, %v855_v1  ;;  %665 = vmatpush3.bf16.msra.mxu1 %v664_v52 }
 0x14f   :  { %666 = vmatprep.subr.bf16.mxu1 %v853_v0 }
 0x152   :  { %668 = vmatpush3.bf16.msra.mxu1 %v667_v54 }
 0x153   :  { %669 = vmatprep.subr.bf16.mxu1 %v853_v0 }
 0x156   :  { %671 = vmatpush3.bf16.msra.mxu1 %v670_v57 }
 0x157   :  { %672 = vmatprep.subr.bf16.mxu1 %v853_v0 }
 0x15a   :  { %674 = vmatpush3.bf16.msra.mxu1 %v673_v60 }
 0x15b   :  { %675 = vmatprep.subr.bf16.mxu1 %v853_v0 }
 0x15e   :  { %677 = vmatpush3.bf16.msra.mxu1 %v676_v8 }
 0x15f   :  { %678 = vmatprep.subr.bf16.mxu1 %v853_v0 }
 0x162   :  { %680 = vmatpush3.bf16.msra.mxu1 %v679_v11 }
 0x163   :  { %681 = vmatprep.subr.bf16.mxu1 %v853_v0 }
 0x166   :  { %683 = vmatpush3.bf16.msra.mxu1 %v682_v14 }
 0x167   :  { %684 = vmatprep.subr.bf16.mxu1 %v853_v0 }
 0x16a   :  { %686 = vmatpush3.bf16.msra.mxu1 %v685_v17 }
 0x220   :  { %v271_v45 = vpop.f32.mrb[0].mxu1 }
 0x221   :  { %v272_v46 = vadd.f32 %v486_v44, %v271_v45  ;;  %v572_v47 = vpop.f32.mrb[1].mxu1 }
 0x223   :  { %700 = vtanh.f32 %v272_v46 }
 0x22d   :  { %v701_v48 = vpop.eup %700 }
 0x22e   :  { %590 = vmatmul.mubr.msk.f32.vlgmr.msra.gmra.mrb[2].mxu0 %vm112_vm1, %v701_v48 }
 0x301   :  { %v360_v1 = vpop.f32.mrb[2].mxu0 }
 0x302   :  { %v361_v2 = vadd.f32 %v488_v63, %v360_v1  ;;  %v591_v3 = vpop.f32.mrb[3].mxu0 }
 0x304   :  { %v367_v4 = vsel %vm366_vm2, %v361_v2, -inf }
 0x305   :  { %v369_v5 = vsel %vm368_vm3, %v367_v4, -inf }
 0x306   :  { %370 = vmax.xlane.f32.xlu0 %v369_v5 }
 0x393   :  { %v371_v18 = vpop.xlane.xlu0 %370 }
 0x394   :  { %v372_v19 = vsub.f32 %v361_v2, %v371_v18 }
 0x396   :  { %v373_v20 = vmul.f32 1.442695, %v372_v19 }
 0x398   :  { %702 = vpow2.f32 %v373_v20 }
 0x3a2   :  { %v703_v21 = vpop.eup %702 }
 0x3a3   :  { %625 = vmatmul.mubr.msk.f32.vlgmr.msra.gmra.mrb[2].mxu1 %vm366_vm2, %v703_v21 }
 0x476   :  { %v458_v22 = vpop.f32.mrb[2].mxu1 }
 0x477   :  { %v462_v23 = vsel %vm366_vm2, %v458_v22, 1.0  ;;  %v626_v24 = vpop.f32.mrb[3].mxu1 }
 0x478   :  { %704 = vlog2.f32 %v462_v23 }
 0x482   :  { %v705_v25 = vpop.eup %704 }
 0x483   :  { %v464_v26 = vmul.f32 0.6931472, %v705_v25 }
 0x485   :  { %v465_v27 = vsub.f32 %v372_v19, %v464_v26 }
 0x487   :  { %466 = vst [vmem:[#allocation11] sm:$0x3] %v465_v27 }
 0x488   :  { %827 = shalt.err (!%p824_p2)
}
 0x489   :  { %s828_s27 = scalar_lea.hbm %s1033_s8, 32 }
 0x48a   :  { %p829_p3 = scmp.ne.s32.totalorder %s1033_s8, %s828_s27  ;;  %p832_p4 = scmp.lt.u32.totalorder %s828_s27, %s1033_s8 }
 0x48c   :  { %p834_p5 = pnand %p832_p4, %p829_p3 }
 0x48e   :  { %837 = shalt.err (!%p834_p5)
}
 0x48f   :  { %476 = dma.vmem_to_hbm [thread:$0]  %s474_s23, 32, %s1033_s8, [#allocation4]  }
 0x490   :  { %844 = dma.done.wait [#allocation4], 32  }
 0x491   :  { %845 = vsyncadd [#allocation4], 4294967264 }
 0x492   :  { %480 = vsyncpa [#allocation3], 1 }
 0x493   :  { %481 = vsyncpa [#allocation6], 1 }
 0x494   :  { %482 = vsyncpa [#allocation9], 1 }
 0x495   :  { %483 = vsyncpa [#allocation4], 1 }

// kernel: tpu_custom_call.1
= control target key start
LH: loop header
LB: loop body
LE: loop exit
PB: predicated region body
PF: predicated region fallthrough
CT: control target
= control target key end

     0   :  { %13 = vsyncpa [#allocation3], 0  ;;  %s1025_s0 = inlined_call_operand.hbm [shape: f32[2,64], index: 0, kind: input, shape index: {}]   ;;  %s1026_s1 = inlined_call_operand.hbm [shape: f32[64,64], index: 1, kind: input, shape index: {}]   ;;  %s1027_s2 = inlined_call_operand.vmem [shape: f32[1,64], index: 2, kind: input, shape index: {}]   ;;  %s1028_s3 = inlined_call_operand.hbm [shape: f32[64,64], index: 3, kind: input, shape index: {}]   ;;  %s1029_s4 = inlined_call_operand.vmem [shape: f32[1,64], index: 4, kind: input, shape index: {}]   ;;  %s1030_s5 = inlined_call_operand.hbm [shape: f32[64,128], index: 5, kind: input, shape index: {}]   ;;  %s1031_s6 = inlined_call_operand.vmem [shape: f32[1,128], index: 6, kind: input, shape index: {}]   ;;  %s1032_s7 = inlined_call_operand.hbm [shape: f32[128,128], index: 7, kind: input, shape index: {}]   ;;  %s1033_s8 = inlined_call_operand.hbm [shape: f32[2,128], index: 8, kind: output, shape index: {}]  }
   0x1   :  { %14 = vsyncpa [#allocation6], 0 }
   0x2   :  { %15 = vsyncpa [#allocation9], 0 }
   0x3   :  { %16 = vsyncpa [#allocation4], 0  ;;  %s846_s27 = smov [#allocation5]   ;;  %s706_s9 = scalar_lea.hbm %s1026_s1, 1024 }
   0x4   :  { %s32_s28 = sshll.u32 %s846_s27, 4  ;;  %p707_p0 = scmp.ne.s32.totalorder %s1026_s1, %s706_s9  ;;  %s33_s28 = int_to_ptr.vmem [resolvable:$true] %s32_s28 }
   0x5   :  { %p710_p1 = scmp.lt.u32.totalorder %s706_s9, %s1026_s1 }
   0x7   :  { %p712_p2 = pnand %p710_p1, %p707_p0 }
   0x9   :  { %715 = shalt.err (!%p712_p2)
}
   0xa   :  { %s716_s14 = scalar_lea.vmem %s33_s28, 1024  ;;  %p721_p4 = scmp.lt.s32.totalorder %s33_s28, %s33_s28 }
   0xb   :  { %p717_p3 = scmp.ne.s32.totalorder %s33_s28, %s716_s14  ;;  %p722_p5 = scmp.lt.s32.totalorder %s716_s14, %s716_s14 }
   0xd   :  { %p723_p6 = por %p722_p5, %p721_p4 }
   0xf   :  { %p724_p7 = pnand %p723_p6, %p717_p3 }
  0x11   :  { %727 = shalt.err (!%p724_p7)
}
  0x12   :  { %s847_s15 = smov 128   ;;  %s848_s16 = smov 8  }
  0x13   :  { %38 = dma.hbm_to_vmem [thread:$0]  %s1026_s1, 1024, %s33_s28, [#allocation6], %s847_s15, %s847_s15, %s848_s16  }
  0x14   :  { %s849_s19 = smov [#allocation8]   ;;  %s850_s21 = smov [#allocation2]  }
  0x15   :  { %s60_s20 = sshll.u32 %s849_s19, 4  ;;  %s23_s22 = sshll.u32 %s850_s21, 4  ;;  %s61_s20 = int_to_ptr.vmem [resolvable:$true] %s60_s20  ;;  %s24_s22 = int_to_ptr.vmem [resolvable:$true] %s23_s22 }
  0x16   :  { %s728_s25 = scalar_lea.hbm %s1030_s5, 1024 }
  0x17   :  { %p729_p8 = scmp.ne.s32.totalorder %s1030_s5, %s728_s25  ;;  %p732_p9 = scmp.lt.u32.totalorder %s728_s25, %s1030_s5 }
  0x19   :  { %p734_p10 = pnand %p732_p9, %p729_p8 }
  0x1b   :  { %737 = shalt.err (!%p734_p10)
}
  0x1c   :  { %s738_s1 = scalar_lea.vmem %s61_s20, 1024  ;;  %p743_p12 = scmp.lt.s32.totalorder %s61_s20, %s61_s20 }
  0x1d   :  { %p739_p11 = scmp.ne.s32.totalorder %s61_s20, %s738_s1  ;;  %p744_p13 = scmp.lt.s32.totalorder %s738_s1, %s738_s1 }
  0x1f   :  { %p745_p0 = por %p744_p13, %p743_p12 }
  0x21   :  { %p746_p1 = pnand %p745_p0, %p739_p11 }
  0x23   :  { %749 = shalt.err (!%p746_p1)
}
  0x24   :  { %66 = dma.hbm_to_vmem [thread:$0]  %s1030_s5, 1024, %s61_s20, [#allocation9], %s847_s15, %s847_s15, %s848_s16  }
  0x25   :  { %s750_s12 = scalar_lea.hbm %s1025_s0, 32 }
  0x26   :  { %p751_p2 = scmp.ne.s32.totalorder %s1025_s0, %s750_s12  ;;  %p754_p3 = scmp.lt.u32.totalorder %s750_s12, %s1025_s0 }
  0x28   :  { %p756_p4 = pnand %p754_p3, %p751_p2 }
  0x2a   :  { %759 = shalt.err (!%p756_p4)
}
  0x2b   :  { %s760_s19 = scalar_lea.vmem %s24_s22, 32  ;;  %p765_p6 = scmp.lt.s32.totalorder %s24_s22, %s24_s22 }
  0x2c   :  { %p761_p5 = scmp.ne.s32.totalorder %s24_s22, %s760_s19  ;;  %p766_p7 = scmp.lt.s32.totalorder %s760_s19, %s760_s19 }
  0x2e   :  { %p767_p8 = por %p766_p7, %p765_p6 }
  0x30   :  { %p768_p9 = pnand %p767_p8, %p761_p5 }
  0x32   :  { %771 = shalt.err (!%p768_p9)
}
  0x33   :  { %26 = dma.hbm_to_vmem [thread:$0]  %s1025_s0, 32, %s24_s22, [#allocation3]  }
  0x34   :  { %s851_s21 = smov [#allocation7]   ;;  %s852_s24 = smov [#allocation10]  }
  0x35   :  { %s46_s23 = sshll.u32 %s851_s21, 4  ;;  %s74_s25 = sshll.u32 %s852_s24, 4  ;;  %s47_s23 = int_to_ptr.vmem [resolvable:$true] %s46_s23  ;;  %s75_s25 = int_to_ptr.vmem [resolvable:$true] %s74_s25 }
  0x36   :  { %s772_s29 = scalar_lea.hbm %s1028_s3, 1024 }
  0x37   :  { %p773_p10 = scmp.ne.s32.totalorder %s1028_s3, %s772_s29  ;;  %p776_p11 = scmp.lt.u32.totalorder %s772_s29, %s1028_s3 }
  0x39   :  { %p778_p12 = pnand %p776_p11, %p773_p10 }
  0x3b   :  { %781 = shalt.err (!%p778_p12)
}
  0x3c   :  { %s782_s0 = scalar_lea.vmem %s47_s23, 1024  ;;  %p787_p0 = scmp.lt.s32.totalorder %s47_s23, %s47_s23 }
  0x3d   :  { %p783_p13 = scmp.ne.s32.totalorder %s47_s23, %s782_s0  ;;  %p788_p1 = scmp.lt.s32.totalorder %s782_s0, %s782_s0 }
  0x3f   :  { %p789_p2 = por %p788_p1, %p787_p0 }
  0x41   :  { %p790_p3 = pnand %p789_p2, %p783_p13 }
  0x43   :  { %793 = shalt.err (!%p790_p3)
}
  0x44   :  { %52 = dma.hbm_to_vmem [thread:$0]  %s1028_s3, 1024, %s47_s23, [#allocation6], %s847_s15, %s847_s15, %s848_s16  }
  0x45   :  { %s794_s13 = scalar_lea.hbm %s1032_s7, 2048 }
  0x46   :  { %p795_p4 = scmp.ne.s32.totalorder %s1032_s7, %s794_s13  ;;  %p798_p5 = scmp.lt.u32.totalorder %s794_s13, %s1032_s7 }
  0x48   :  { %p800_p6 = pnand %p798_p5, %p795_p4 }
  0x4a   :  { %803 = shalt.err (!%p800_p6)
}
  0x4b   :  { %s804_s5 = scalar_lea.vmem %s75_s25, 2048  ;;  %p809_p8 = scmp.lt.s32.totalorder %s75_s25, %s75_s25 }
  0x4c   :  { %p805_p7 = scmp.ne.s32.totalorder %s75_s25, %s804_s5  ;;  %p810_p9 = scmp.lt.s32.totalorder %s804_s5, %s804_s5 }
  0x4e   :  { %p811_p10 = por %p810_p9, %p809_p8 }
  0x50   :  { %p812_p11 = pnand %p811_p10, %p805_p7 }
  0x52   :  { %815 = shalt.err (!%p812_p11)
}
  0x53   :  { %80 = dma.hbm_to_vmem [thread:$0]  %s1032_s7, 2048, %s75_s25, [#allocation9], %s847_s15, %s847_s15, %s848_s16  }
  0x54   :  { %838 = dma.done.wait [#allocation3], 32  }
  0x55   :  { %839 = vsyncadd [#allocation3], 4294967264 }
  0x56   :  { %840 = dma.done.wait [#allocation6], 2048  }
  0x57   :  { %841 = vsyncadd [#allocation6], 4294965248 }
  0x58   :  { %842 = dma.done.wait [#allocation9], 3072  }
  0x59   :  { %843 = vsyncadd [#allocation9], 4294964224  ;;  %v853_v0 = vmov 0.0|0.0   ;;  %vm854_vm0 = vmmov 0   ;;  %v855_v1 = vmov 0.0   ;;  %v97_v2 = vld [vmem:[#allocation5] sm:$0xff]  ;;  %v364_v61 = vlaneseq }
  0x5a   :  { %627 = vmatprep.subr.bf16.mxu0 %v853_v0  ;;  %551 = vmatprep.mubr.msk.f32.mxu0 %vm854_vm0, %v855_v1  ;;  %v98_v3 = vld [vmem:[#allocation5 + $0x8] sm:$0xff]  ;;  %v99_v4 = vld [vmem:[#allocation5 + $0x10] sm:$0xff]  ;;  %v100_v6 = vld [vmem:[#allocation5 + $0x18] sm:$0xff]  ;;  %vm112_vm1 = vcmask 523264   ;;  %vm368_vm3 = vcmask 1041408  }
  0x5b   :  { %639 = vmatprep.subr.bf16.mxu1 %v853_v0  ;;  %570 = vmatprep.mubr.msk.f32.mxu1 %vm854_vm0, %v855_v1  ;;  %v628_v5 = vpack.c.bf16 %v98_v3, %v97_v2  ;;  %v631_v7 = vpack.c.bf16 %v100_v6, %v99_v4  ;;  %v187_v8 = vld [vmem:[#allocation7] sm:$0xff]  ;;  %v188_v9 = vld [vmem:[#allocation7 + $0x8] sm:$0xff]  ;;  %v103_v14 = vld [vmem:[#allocation5 + $0x30] sm:$0xff]  ;;  %v365_v62 = vand.u32 127, %v364_v61 }
  0x5c   :  { %v101_v10 = vld [vmem:[#allocation5 + $0x20] sm:$0xff]  ;;  %v102_v11 = vld [vmem:[#allocation5 + $0x28] sm:$0xff]  ;;  %v640_v12 = vpack.c.bf16 %v188_v9, %v187_v8  ;;  %v104_v15 = vld [vmem:[#allocation5 + $0x38] sm:$0xff] }
  0x5d   :  { %629 = vmatpush3.bf16.msra.mxu0 %v628_v5  ;;  %v634_v13 = vpack.c.bf16 %v102_v11, %v101_v10  ;;  %v637_v16 = vpack.c.bf16 %v104_v15, %v103_v14  ;;  %v96_v17 = vld [vmem:[#allocation2] sm:$0x3]  ;;  %v189_v18 = vld [vmem:[#allocation7 + $0x10] sm:$0xff]  ;;  %v191_v21 = vld [vmem:[#allocation7 + $0x20] sm:$0xff]  ;;  %vm366_vm2 = vcmp.lt.s32.totalorder %v365_v62, 32 }
  0x5e   :  { %630 = vmatprep.subr.bf16.mxu0 %v853_v0  ;;  %641 = vmatpush3.bf16.msra.mxu1 %v640_v12  ;;  %v190_v19 = vld [vmem:[#allocation7 + $0x18] sm:$0xff]  ;;  %v192_v22 = vld [vmem:[#allocation7 + $0x28] sm:$0xff]  ;;  %v193_v24 = vld [vmem:[#allocation7 + $0x30] sm:$0xff] }
  0x5f   :  { %642 = vmatprep.subr.bf16.mxu1 %v853_v0  ;;  %v643_v20 = vpack.c.bf16 %v190_v19, %v189_v18  ;;  %v646_v23 = vpack.c.bf16 %v192_v22, %v191_v21  ;;  %v194_v25 = vld [vmem:[#allocation7 + $0x38] sm:$0xff]  ;;  %v276_v27 = vld [vmem:[#allocation8] sm:$0xff]  ;;  %v277_v28 = vld [vmem:[#allocation8 + $0x8] sm:$0xff] }
  0x60   :  { %v649_v26 = vpack.c.bf16 %v194_v25, %v193_v24  ;;  %v652_v29 = vpack.c.bf16 %v277_v28, %v276_v27  ;;  %v484_v30 = vld [vmem:[%s1027_s2] ss:$0 sm:$0xff]  ;;  %v278_v35 = vld [vmem:[#allocation8 + $0x10] sm:$0xff]  ;;  %v280_v38 = vld [vmem:[#allocation8 + $0x20] sm:$0xff] }
  0x61   :  { %632 = vmatpush3.bf16.msra.mxu0 %v631_v7  ;;  %v279_v36 = vld [vmem:[#allocation8 + $0x18] sm:$0xff]  ;;  %v281_v39 = vld [vmem:[#allocation8 + $0x28] sm:$0xff]  ;;  %v282_v41 = vld [vmem:[#allocation8 + $0x30] sm:$0xff] }
  0x62   :  { %633 = vmatprep.subr.bf16.mxu0 %v853_v0  ;;  %644 = vmatpush3.bf16.msra.mxu1 %v643_v20  ;;  %v655_v37 = vpack.c.bf16 %v279_v36, %v278_v35  ;;  %v658_v40 = vpack.c.bf16 %v281_v39, %v280_v38  ;;  %v283_v42 = vld [vmem:[#allocation8 + $0x38] sm:$0xff]  ;;  %v376_v49 = vld [vmem:[#allocation10] sm:$0xff]  ;;  %v377_v50 = vld [vmem:[#allocation10 + $0x8] sm:$0xff] }
  0x63   :  { %645 = vmatprep.subr.bf16.mxu1 %v853_v0  ;;  %v661_v43 = vpack.c.bf16 %v283_v42, %v282_v41  ;;  %v486_v44 = vld [vmem:[%s1029_s4] ss:$0 sm:$0xff]  ;;  %v378_v51 = vld [vmem:[#allocation10 + $0x10] sm:$0xff]  ;;  %v664_v52 = vpack.c.bf16 %v377_v50, %v376_v49  ;;  %v380_v55 = vld [vmem:[#allocation10 + $0x20] sm:$0xff] }
  0x64   :  { %v379_v53 = vld [vmem:[#allocation10 + $0x18] sm:$0xff]  ;;  %v381_v56 = vld [vmem:[#allocation10 + $0x28] sm:$0xff]  ;;  %v382_v58 = vld [vmem:[#allocation10 + $0x30] sm:$0xff] }
  0x65   :  { %635 = vmatpush3.bf16.msra.mxu0 %v634_v13  ;;  %v667_v54 = vpack.c.bf16 %v379_v53, %v378_v51  ;;  %v670_v57 = vpack.c.bf16 %v381_v56, %v380_v55  ;;  %v383_v59 = vld [vmem:[#allocation10 + $0x38] sm:$0xff]  ;;  %v384_v6 = vld [vmem:[#allocation10 + $0x40] sm:$0xff]  ;;  %v385_v7 = vld [vmem:[#allocation10 + $0x48] sm:$0xff] }
  0x66   :  { %636 = vmatprep.subr.bf16.mxu0 %v853_v0  ;;  %647 = vmatpush3.bf16.msra.mxu1 %v646_v23  ;;  %v673_v60 = vpack.c.bf16 %v383_v59, %v382_v58  ;;  %v488_v63 = vld [vmem:[%s1031_s6] ss:$0 sm:$0xff]  ;;  %v676_v8 = vpack.c.bf16 %v385_v7, %v384_v6  ;;  %v386_v9 = vld [vmem:[#allocation10 + $0x50] sm:$0xff]  ;;  %v388_v12 = vld [vmem:[#allocation10 + $0x60] sm:$0xff]  ;;  %s856_s6 = smov [#allocation11]  }
  0x67   :  { %648 = vmatprep.subr.bf16.mxu1 %v853_v0  ;;  %v387_v10 = vld [vmem:[#allocation10 + $0x58] sm:$0xff]  ;;  %v389_v13 = vld [vmem:[#allocation10 + $0x68] sm:$0xff]  ;;  %v390_v15 = vld [vmem:[#allocation10 + $0x70] sm:$0xff]  ;;  %s473_s23 = sshll.u32 %s856_s6, 4  ;;  %s474_s23 = int_to_ptr.vmem [resolvable:$true] %s473_s23 }
  0x68   :  { %v679_v11 = vpack.c.bf16 %v387_v10, %v386_v9  ;;  %v682_v14 = vpack.c.bf16 %v389_v13, %v388_v12  ;;  %s816_s24 = scalar_lea.vmem %s474_s23, 32  ;;  %p821_p13 = scmp.lt.s32.totalorder %s474_s23, %s474_s23 }
  0x69   :  { %638 = vmatpush3.bf16.msra.mxu0 %v637_v16  ;;  %v391_v16 = vld [vmem:[#allocation10 + $0x78] sm:$0xff]  ;;  %p817_p12 = scmp.ne.s32.totalorder %s474_s23, %s816_s24  ;;  %p822_p0 = scmp.lt.s32.totalorder %s816_s24, %s816_s24 }
  0x6a   :  { %651 = vmatprep.subr.bf16.mxu0 %v853_v0  ;;  %650 = vmatpush3.bf16.msra.mxu1 %v649_v26 }
  0x6b   :  { %663 = vmatprep.subr.bf16.mxu1 %v853_v0  ;;  %p823_p1 = por %p822_p0, %p821_p13 }
  0x6c   :  { %552 = vmatmul.mubr.msk.f32.vlgmr.msra.gmra.mrb[0].mxu0 %vm112_vm1, %v96_v17  ;;  %v685_v17 = vpack.c.bf16 %v391_v16, %v390_v15 }
  0x6d   :  { %589 = vmatprep.mubr.msk.f32.mxu0 %vm854_vm0, %v855_v1  ;;  %653 = vmatpush3.bf16.msra.mxu0 %v652_v29  ;;  %p824_p2 = pnand %p823_p1, %p817_p12 }
  0x6e   :  { %654 = vmatprep.subr.bf16.mxu0 %v853_v0 }
  0x71   :  { %656 = vmatpush3.bf16.msra.mxu0 %v655_v37 }
  0x72   :  { %657 = vmatprep.subr.bf16.mxu0 %v853_v0 }
  0x75   :  { %659 = vmatpush3.bf16.msra.mxu0 %v658_v40 }
  0x76   :  { %660 = vmatprep.subr.bf16.mxu0 %v853_v0 }
  0x79   :  { %662 = vmatpush3.bf16.msra.mxu0 %v661_v43 }
 0x13f   :  { %v182_v31 = vpop.f32.mrb[0].mxu0 }
 0x140   :  { %v183_v32 = vadd.f32 %v484_v30, %v182_v31  ;;  %v553_v33 = vpop.f32.mrb[1].mxu0 }
 0x142   :  { %698 = vtanh.f32 %v183_v32 }
 0x14c   :  { %v699_v34 = vpop.eup %698 }
 0x14d   :  { %571 = vmatmul.mubr.msk.f32.vlgmr.msra.gmra.mrb[0].mxu1 %vm112_vm1, %v699_v34 }
 0x14e   :  { %624 = vmatprep.mubr.msk.f32.mxu1 %vm854_vm0, %v855_v1  ;;  %665 = vmatpush3.bf16.msra.mxu1 %v664_v52 }
 0x14f   :  { %666 = vmatprep.subr.bf16.mxu1 %v853_v0 }
 0x152   :  { %668 = vmatpush3.bf16.msra.mxu1 %v667_v54 }
 0x153   :  { %669 = vmatprep.subr.bf16.mxu1 %v853_v0 }
 0x156   :  { %671 = vmatpush3.bf16.msra.mxu1 %v670_v57 }
 0x157   :  { %672 = vmatprep.subr.bf16.mxu1 %v853_v0 }
 0x15a   :  { %674 = vmatpush3.bf16.msra.mxu1 %v673_v60 }
 0x15b   :  { %675 = vmatprep.subr.bf16.mxu1 %v853_v0 }
 0x15e   :  { %677 = vmatpush3.bf16.msra.mxu1 %v676_v8 }
 0x15f   :  { %678 = vmatprep.subr.bf16.mxu1 %v853_v0 }
 0x162   :  { %680 = vmatpush3.bf16.msra.mxu1 %v679_v11 }
 0x163   :  { %681 = vmatprep.subr.bf16.mxu1 %v853_v0 }
 0x166   :  { %683 = vmatpush3.bf16.msra.mxu1 %v682_v14 }
 0x167   :  { %684 = vmatprep.subr.bf16.mxu1 %v853_v0 }
 0x16a   :  { %686 = vmatpush3.bf16.msra.mxu1 %v685_v17 }
 0x220   :  { %v271_v45 = vpop.f32.mrb[0].mxu1 }
 0x221   :  { %v272_v46 = vadd.f32 %v486_v44, %v271_v45  ;;  %v572_v47 = vpop.f32.mrb[1].mxu1 }
 0x223   :  { %700 = vtanh.f32 %v272_v46 }
 0x22d   :  { %v701_v48 = vpop.eup %700 }
 0x22e   :  { %590 = vmatmul.mubr.msk.f32.vlgmr.msra.gmra.mrb[2].mxu0 %vm112_vm1, %v701_v48 }
 0x301   :  { %v360_v1 = vpop.f32.mrb[2].mxu0 }
 0x302   :  { %v361_v2 = vadd.f32 %v488_v63, %v360_v1  ;;  %v591_v3 = vpop.f32.mrb[3].mxu0 }
 0x304   :  { %v367_v4 = vsel %vm366_vm2, %v361_v2, -inf }
 0x305   :  { %v369_v5 = vsel %vm368_vm3, %v367_v4, -inf }
 0x306   :  { %370 = vmax.xlane.f32.xlu0 %v369_v5 }
 0x393   :  { %v371_v18 = vpop.xlane.xlu0 %370 }
 0x394   :  { %v372_v19 = vsub.f32 %v361_v2, %v371_v18 }
 0x396   :  { %v373_v20 = vmul.f32 1.442695, %v372_v19 }
 0x398   :  { %702 = vpow2.f32 %v373_v20 }
 0x3a2   :  { %v703_v21 = vpop.eup %702 }
 0x3a3   :  { %625 = vmatmul.mubr.msk.f32.vlgmr.msra.gmra.mrb[2].mxu1 %vm366_vm2, %v703_v21 }
 0x476   :  { %v458_v22 = vpop.f32.mrb[2].mxu1 }
 0x477   :  { %v462_v23 = vsel %vm366_vm2, %v458_v22, 1.0  ;;  %v626_v24 = vpop.f32.mrb[3].mxu1 }
 0x478   :  { %704 = vlog2.f32 %v462_v23 }
 0x482   :  { %v705_v25 = vpop.eup %704 }
 0x483   :  { %v464_v26 = vmul.f32 0.6931472, %v705_v25 }
 0x485   :  { %v465_v27 = vsub.f32 %v372_v19, %v464_v26 }
 0x487   :  { %466 = vst [vmem:[#allocation11] sm:$0x3] %v465_v27 }
 0x488   :  { %827 = shalt.err (!%p824_p2)
}
 0x489   :  { %s828_s27 = scalar_lea.hbm %s1033_s8, 32 }
 0x48a   :  { %p829_p3 = scmp.ne.s32.totalorder %s1033_s8, %s828_s27  ;;  %p832_p4 = scmp.lt.u32.totalorder %s828_s27, %s1033_s8 }
 0x48c   :  { %p834_p5 = pnand %p832_p4, %p829_p3 }
 0x48e   :  { %837 = shalt.err (!%p834_p5)
}
 0x48f   :  { %476 = dma.vmem_to_hbm [thread:$0]  %s474_s23, 32, %s1033_s8, [#allocation4]  }
 0x490   :  { %844 = dma.done.wait [#allocation4], 32  }
 0x491   :  { %845 = vsyncadd [#allocation4], 4294967264 }
 0x492   :  { %480 = vsyncpa [#allocation3], 1 }
 0x493   :  { %481 = vsyncpa [#allocation6], 1 }
 0x494   :  { %482 = vsyncpa [#allocation9], 1 }
 0x495   :  { %483 = vsyncpa [#allocation4], 1 }

</bundles_post_ra>
